<compile_context>
chip_gen: v5e
topology: v5e:2x2
jax: 0.10.0
libtpu: 0.0.40
codegen_flags: <defaults>
</compile_context>

<pallas_src>
import jax
import jax.numpy as jnp
from jax import lax
from jax.experimental import pallas as pl
from jax.experimental.pallas import tpu as pltpu

EPS = 1e-5


def bn_relu_kernel(x_ref, g_ref, b_ref, o_ref):
    # x_ref: (R, C) -- R = N*H*W on sublanes, C = 128 channels lane-dense.
    # g_ref, b_ref: (1, C) row vectors (gamma, beta).
    x = x_ref[...].astype(jnp.float32)
    r = x.shape[0]
    inv_r = 1.0 / r

    # Single pass over x: sum and sum of squares (sublane reduces -> XLU).
    s = jnp.sum(x, axis=0, keepdims=True)            # (1, C)
    ss = jnp.sum(x * x, axis=0, keepdims=True)       # (1, C)

    mean = s * inv_r
    # Biased (training-mode) variance, clamped to avoid cancellation NaNs.
    var = jnp.maximum(ss * inv_r - mean * mean, 0.0)
    inv_std = lax.rsqrt(var + EPS)                   # EUP slot, one dense vreg

    gamma = g_ref[...].astype(jnp.float32)           # (1, C)
    beta = b_ref[...].astype(jnp.float32)            # (1, C)
    scale = gamma * inv_std                          # (1, C)
    shift = beta - mean * scale                      # (1, C)

    # One multiply-add per element, then ReLU; full-width unmasked stores.
    y = x * scale + shift
    o_ref[...] = jnp.maximum(y, 0.0).astype(o_ref.dtype)


def batchnorm_relu(x_nchw, gamma, beta):
    """x_nchw: (N, C, H, W); gamma/beta: (C,). Training-mode BN + ReLU."""
    n, c, h, w = x_nchw.shape
    r = n * h * w

    # Channels-on-lanes layout: (R, C) with C = 128 lane-dense.
    x2d = jnp.transpose(x_nchw, (0, 2, 3, 1)).reshape(r, c)
    g2d = gamma.reshape(1, c)                        # pure reshape, no dispatch
    b2d = beta.reshape(1, c)

    out2d = pl.pallas_call(
        bn_relu_kernel,
        out_shape=jax.ShapeDtypeStruct((r, c), x_nchw.dtype),
        in_specs=[
            pl.BlockSpec(memory_space=pltpu.MemorySpace.VMEM),
            pl.BlockSpec(memory_space=pltpu.MemorySpace.VMEM),
            pl.BlockSpec(memory_space=pltpu.MemorySpace.VMEM),
        ],
        out_specs=pl.BlockSpec(memory_space=pltpu.MemorySpace.VMEM),
        cost_estimate=pl.CostEstimate(
            flops=6 * c * r,
            transcendentals=c,
            bytes_accessed=(2 * c * r + 2 * c) * 4,
        ),
    )(x2d, g2d, b2d)

    # Back to the module's NCHW output layout.
    return jnp.transpose(out2d.reshape(n, h, w, c), (0, 3, 1, 2))


if __name__ == "__main__":
    key = jax.random.PRNGKey(0)
    kx, kg, kb = jax.random.split(key, 3)

    # Shapes from the module: x366 = randn([1, 128, 7, 7]); BatchNorm2d(128)
    x = jax.random.normal(kx, (1, 128, 7, 7), dtype=jnp.float32)
    gamma = 1.0 + 0.1 * jax.random.normal(kg, (128,), dtype=jnp.float32)
    beta = 0.1 * jax.random.normal(kb, (128,), dtype=jnp.float32)

    fn = jax.jit(batchnorm_relu)
    out = fn(x, gamma, beta)
    jax.block_until_ready(out)

    # Reference check in plain JAX (training-mode BN + ReLU).
    mean = jnp.mean(x, axis=(0, 2, 3), keepdims=True)
    var = jnp.mean((x - mean) ** 2, axis=(0, 2, 3), keepdims=True)
    ref = (x - mean) / jnp.sqrt(var + EPS)
    ref = ref * gamma.reshape(1, -1, 1, 1) + beta.reshape(1, -1, 1, 1)
    ref = jnp.maximum(ref, 0.0)
    assert out.shape == x.shape
    assert jnp.allclose(out, ref, atol=1e-4, rtol=1e-4), "mismatch vs reference"

    print("KERNEL_OK")
</pallas_src>

<mosaic_0001>
module attributes {stable_mosaic.version = 11 : i64} {
  func.func @bn_relu_kernel(%arg0: memref<49x128xf32, #tpu.memory_space<vmem>>, %arg1: memref<1x128xf32, #tpu.memory_space<vmem>>, %arg2: memref<1x128xf32, #tpu.memory_space<vmem>>, %arg3: memref<49x128xf32, #tpu.memory_space<vmem>>) attributes {dimension_semantics = [], scalar_prefetch = 0 : i64, scratch_operands = 0 : i64, tpu.core_type = #tpu.core_type<tc>} {
    %c0 = arith.constant 0 : index
    %c0_0 = arith.constant 0 : index
    %0 = vector.load %arg0[%c0, %c0_0] : memref<49x128xf32, #tpu.memory_space<vmem>>, vector<49x128xf32>
    %cst = arith.constant dense<0.000000e+00> : vector<128xf32>
    %1 = vector.multi_reduction <add>, %0, %cst [0] : vector<49x128xf32> to vector<128xf32>
    %2 = vector.shape_cast %1 : vector<128xf32> to vector<1x128xf32>
    %3 = arith.mulf %0, %0 : vector<49x128xf32>
    %cst_1 = arith.constant dense<0.000000e+00> : vector<128xf32>
    %4 = vector.multi_reduction <add>, %3, %cst_1 [0] : vector<49x128xf32> to vector<128xf32>
    %5 = vector.shape_cast %4 : vector<128xf32> to vector<1x128xf32>
    %cst_2 = arith.constant 0.0204081628 : f32
    %6 = vector.broadcast %cst_2 : f32 to vector<1x128xf32>
    %7 = arith.mulf %2, %6 : vector<1x128xf32>
    %cst_3 = arith.constant 0.0204081628 : f32
    %8 = vector.broadcast %cst_3 : f32 to vector<1x128xf32>
    %9 = arith.mulf %5, %8 : vector<1x128xf32>
    %10 = arith.mulf %7, %7 : vector<1x128xf32>
    %11 = arith.subf %9, %10 : vector<1x128xf32>
    %cst_4 = arith.constant 0.000000e+00 : f32
    %12 = vector.broadcast %cst_4 : f32 to vector<1x128xf32>
    %13 = arith.maximumf %11, %12 : vector<1x128xf32>
    %cst_5 = arith.constant 9.99999974E-6 : f32
    %14 = vector.broadcast %cst_5 : f32 to vector<1x128xf32>
    %15 = arith.addf %13, %14 : vector<1x128xf32>
    %16 = math.rsqrt %15 : vector<1x128xf32>
    %c0_6 = arith.constant 0 : index
    %c0_7 = arith.constant 0 : index
    %17 = vector.load %arg1[%c0_6, %c0_7] : memref<1x128xf32, #tpu.memory_space<vmem>>, vector<1x128xf32>
    %c0_8 = arith.constant 0 : index
    %c0_9 = arith.constant 0 : index
    %18 = vector.load %arg2[%c0_8, %c0_9] : memref<1x128xf32, #tpu.memory_space<vmem>>, vector<1x128xf32>
    %19 = arith.mulf %17, %16 : vector<1x128xf32>
    %20 = arith.mulf %7, %19 : vector<1x128xf32>
    %21 = arith.subf %18, %20 : vector<1x128xf32>
    %22 = vector.broadcast %19 : vector<1x128xf32> to vector<49x128xf32>
    %23 = arith.mulf %0, %22 : vector<49x128xf32>
    %24 = vector.broadcast %21 : vector<1x128xf32> to vector<49x128xf32>
    %25 = arith.addf %23, %24 : vector<49x128xf32>
    %cst_10 = arith.constant 0.000000e+00 : f32
    %26 = vector.broadcast %cst_10 : f32 to vector<49x128xf32>
    %27 = arith.maximumf %25, %26 : vector<49x128xf32>
    %c0_11 = arith.constant 0 : index
    %c0_12 = arith.constant 0 : index
    %28 = vector.load %arg3[%c0_11, %c0_12] : memref<49x128xf32, #tpu.memory_space<vmem>>, vector<49x128xf32>
    tpu.vector_store %arg3[%c0_11, %c0_12], %27 {strides = array<i32>} : memref<49x128xf32, #tpu.memory_space<vmem>>, vector<49x128xf32>,
    return
  }
}

</mosaic_0001>

<bundles_post_ra>
// kernel: batchnorm_relu.1
= control target key start
LH: loop header
LB: loop body
LE: loop exit
PB: predicated region body
PF: predicated region fallthrough
CT: control target
= control target key end

     0   :  { %vm26_vm0 = vcmask 1040384   ;;  %s214_s0 = inlined_call_operand.vmem [shape: f32[49,128], index: 0, kind: input, shape index: {}]   ;;  %s215_s1 = inlined_call_operand.vmem [shape: f32[1,128], index: 1, kind: input, shape index: {}]   ;;  %s216_s2 = inlined_call_operand.vmem [shape: f32[1,128], index: 2, kind: input, shape index: {}]   ;;  %s217_s3 = inlined_call_operand.vmem [shape: f32[49,128], index: 3, kind: output, shape index: {}]  }
   0x1   :  { %v139_v0 = vld [vmem:[%s214_s0] sm:$0xff]  ;;  %v144_v1 = vld [vmem:[%s214_s0 + $0x8] sm:$0xff]  ;;  %v149_v2 = vld [vmem:[%s214_s0 + $0x10] sm:$0xff] }
   0x2   :  { %v154_v3 = vld [vmem:[%s214_s0 + $0x18] sm:$0xff]  ;;  %v21_v4 = vadd.f32 %v144_v1, %v139_v0  ;;  %v35_v5 = vmul.f32 %v139_v0, %v139_v0  ;;  %v36_v6 = vmul.f32 %v144_v1, %v144_v1  ;;  %v37_v7 = vmul.f32 %v149_v2, %v149_v2  ;;  %v18_v8 = vld [vmem:[%s214_s0 + $0x20] sm:$0xff]  ;;  %v170_v9 = vld [vmem:[%s214_s0 + $0x30] sm:$0x1] }
   0x3   :  { %v38_v11 = vmul.f32 %v154_v3, %v154_v3  ;;  %v19_v13 = vld [vmem:[%s214_s0 + $0x28] sm:$0xff]  ;;  %v39_v15 = vmul.f32 %v18_v8, %v18_v8  ;;  %v41_v17 = vmul.f32 %v170_v9, %v170_v9  ;;  %v27_v21 = vsel %vm26_vm0, %v170_v9, 0.0  ;;  %v71_v52 = vld [vmem:[%s215_s1] sm:$0x1] }
   0x4   :  { %v22_v10 = vadd.f32 %v21_v4, %v149_v2  ;;  %v42_v12 = vadd.f32 %v36_v6, %v35_v5  ;;  %v40_v19 = vmul.f32 %v19_v13, %v19_v13  ;;  %v72_v55 = vld [vmem:[%s216_s2] sm:$0x1] }
   0x5   :  { %v47_v24 = vsel %vm26_vm0, %v41_v17, 0.0 }
   0x6   :  { %v23_v14 = vadd.f32 %v22_v10, %v154_v3  ;;  %v43_v16 = vadd.f32 %v42_v12, %v37_v7 }
   0x8   :  { %v24_v18 = vadd.f32 %v23_v14, %v18_v8  ;;  %v44_v20 = vadd.f32 %v43_v16, %v38_v11 }
   0xa   :  { %v25_v22 = vadd.f32 %v24_v18, %v19_v13  ;;  %v45_v23 = vadd.f32 %v44_v20, %v39_v15 }
   0xc   :  { %v28_v25 = vadd.f32 %v27_v21, %v25_v22  ;;  %v46_v26 = vadd.f32 %v45_v23, %v40_v19 }
   0xe   :  { %v29_v27 = vrot.slane %v28_v25, 4  ;;  %v48_v28 = vadd.f32 %v47_v24, %v46_v26 }
  0x10   :  { %v30_v29 = vadd.f32 %v29_v27, %v28_v25  ;;  %v49_v30 = vrot.slane %v48_v28, 4 }
  0x12   :  { %v31_v31 = vrot.slane %v30_v29, 2  ;;  %v50_v32 = vadd.f32 %v49_v30, %v48_v28 }
  0x14   :  { %v32_v33 = vadd.f32 %v31_v31, %v30_v29  ;;  %v51_v34 = vrot.slane %v50_v32, 2 }
  0x16   :  { %v33_v35 = vrot.slane %v32_v33, 1  ;;  %v52_v36 = vadd.f32 %v51_v34, %v50_v32 }
  0x18   :  { %v34_v37 = vadd.f32 %v33_v35, %v32_v33  ;;  %v53_v38 = vrot.slane %v52_v36, 1 }
  0x1a   :  { %v54_v39 = vadd.f32 %v53_v38, %v52_v36  ;;  %v55_v40 = vmul.f32 0.020408163, %v34_v37 }
  0x1c   :  { %v56_v41 = vmul.f32 0.020408163, %v54_v39  ;;  %v57_v42 = vmul.f32 %v55_v40, %v55_v40 }
  0x1e   :  { %v58_v43 = vsub.f32 %v56_v41, %v57_v42 }
  0x20   :  { %v59_v44 = vmax.f32 %v58_v43, 0.0 }
  0x22   :  { %v60_v45 = vadd.f32 1e-05, %v59_v44 }
  0x24   :  { %114 = vrsqrt.f32 %v60_v45  ;;  %vm67_vm1 = vweird.f32 %v60_v45 }
  0x2a   :  { %v115_v46 = vpop.eup %114 }
  0x2b   :  { %v62_v47 = vmul.f32 %v115_v46, %v60_v45  ;;  %vm68_vm2 = vweird.f32 %v115_v46 }
  0x2c   :  { %vm69_vm3 = vmor %vm67_vm1, %vm68_vm2 }
  0x2d   :  { %v63_v48 = vmul.f32 %v115_v46, %v62_v47 }
  0x2f   :  { %v64_v49 = vmul.f32 0.5, %v63_v48 }
  0x31   :  { %v65_v50 = vsub.f32 1.5, %v64_v49 }
  0x33   :  { %v66_v51 = vmul.f32 %v115_v46, %v65_v50 }
  0x35   :  { %v70_v53 = vsel %vm69_vm3, %v115_v46, %v66_v51 }
  0x36   :  { %v73_v54 = vmul.f32 %v71_v52, %v70_v53 }
  0x38   :  { %v74_v56 = vmul.f32 %v73_v54, %v55_v40  ;;  %v77_v57 = vperm.slane %v73_v54, 0 }
  0x3a   :  { %v75_v58 = vsub.f32 %v72_v55, %v74_v56  ;;  %v79_v59 = vmul.f32 %v77_v57, %v139_v0  ;;  %v80_v60 = vmul.f32 %v77_v57, %v144_v1  ;;  %v81_v61 = vmul.f32 %v77_v57, %v149_v2 }
  0x3b   :  { %v82_v62 = vmul.f32 %v77_v57, %v154_v3  ;;  %v83_v63 = vmul.f32 %v77_v57, %v18_v8  ;;  %v84_v4 = vmul.f32 %v77_v57, %v19_v13  ;;  %v85_v6 = vmul.f32 %v77_v57, %v170_v9 }
  0x3c   :  { %v87_v5 = vperm.slane %v75_v58, 0 }
  0x3e   :  { %v89_v7 = vadd.f32 %v87_v5, %v79_v59  ;;  %v90_v10 = vadd.f32 %v87_v5, %v80_v60  ;;  %v91_v11 = vadd.f32 %v87_v5, %v81_v61  ;;  %v92_v12 = vadd.f32 %v87_v5, %v82_v62 }
  0x3f   :  { %v93_v14 = vadd.f32 %v87_v5, %v83_v63  ;;  %v94_v15 = vadd.f32 %v87_v5, %v84_v4  ;;  %v95_v18 = vadd.f32 %v87_v5, %v85_v6 }
  0x40   :  { %v96_v16 = vmax.f32 %v89_v7, 0.0  ;;  %v97_v17 = vmax.f32 %v90_v10, 0.0  ;;  %v98_v0 = vmax.f32 %v91_v11, 0.0  ;;  %v99_v1 = vmax.f32 %v92_v12, 0.0 }
  0x41   :  { %v100_v2 = vmax.f32 %v93_v14, 0.0  ;;  %v101_v3 = vmax.f32 %v94_v15, 0.0  ;;  %v102_v8 = vmax.f32 %v95_v18, 0.0 }
  0x42   :  { %103 = vst [vmem:[%s217_s3] sm:$0xff] %v96_v16 }
  0x43   :  { %104 = vst [vmem:[%s217_s3 + $0x8] sm:$0xff] %v97_v17 }
  0x44   :  { %105 = vst [vmem:[%s217_s3 + $0x10] sm:$0xff] %v98_v0 }
  0x45   :  { %106 = vst [vmem:[%s217_s3 + $0x18] sm:$0xff] %v99_v1 }
  0x46   :  { %107 = vst [vmem:[%s217_s3 + $0x20] sm:$0xff] %v100_v2 }
  0x47   :  { %108 = vst [vmem:[%s217_s3 + $0x28] sm:$0xff] %v101_v3 }
  0x48   :  { %109 = vst [vmem:[%s217_s3 + $0x30] sm:$0x1] %v102_v8 }

</bundles_post_ra>
